<compile_context>
chip_gen: v7x
topology: tpu7x:2x2x1
jax: 0.10.0
libtpu: 0.0.40
codegen_flags: <defaults>
</compile_context>

<pallas_src>
import jax
import jax.numpy as jnp
from jax.experimental import pallas as pl
from jax.experimental.pallas import tpu as pltpu


def _round_up(n, m):
    return ((n + m - 1) // m) * m


# -----------------------------------------------------------------------------
# Kernel: fused MLP + residual-linear path, transposed (batch-on-lanes) layout.
#   xT          : [F, tm]        (batch on the lane axis, tm % 128 == 0)
#   w1T, b1     : [H1, F], [H1, 1]   (BN1 folded in)
#   w2T, b2     : [H2, H1], [H2, 1]  (BN2 folded in)
#   w3T, wlinT  : [O, H2], [O, F]
#   bcat        : [O, 1]             (= b3 + b_lin)
#   out         : [O, tm]            (lane-dense store)
# -----------------------------------------------------------------------------
def net_kernel(xT_ref, w1T_ref, b1_ref, w2T_ref, b2_ref,
               w3T_ref, wlinT_ref, bcat_ref, out_ref):
    xT = xT_ref[...]

    # Layer 1: Linear (+ folded BN) -> ReLU.  (Dropout: identity in eval.)
    h = jnp.dot(w1T_ref[...], xT,
                preferred_element_type=jnp.float32) + b1_ref[...]
    h = jnp.maximum(h, 0.0)

    # Layer 2: Linear (+ folded BN) -> ReLU.
    h = jnp.dot(w2T_ref[...], h.astype(w2T_ref.dtype),
                preferred_element_type=jnp.float32) + b2_ref[...]
    h = jnp.maximum(h, 0.0)

    # Final layer + residual least-squares path, fused bias:
    #   out = w3^T @ h + w_lin^T @ x^T + (b3 + b_lin)
    out = jnp.dot(w3T_ref[...], h.astype(w3T_ref.dtype),
                  preferred_element_type=jnp.float32)
    out += jnp.dot(wlinT_ref[...], xT, preferred_element_type=jnp.float32)
    out_ref[...] = out + bcat_ref[...]


# -----------------------------------------------------------------------------
# Wrapper: fold BN, transpose weights, tile the batch on lanes, call the kernel.
# -----------------------------------------------------------------------------
def _fold_params(params, use_bf16):
    (w_lin, b_lin, w1, b1, s1, t1, w2, b2, s2, t2, w3, b3) = params

    # Fold BatchNorm (eval) scale/shift into the preceding Linear.
    w1f = w1 * s1                      # [F, H1] * [1, H1]
    b1f = b1 * s1 + t1                 # [1, H1]
    w2f = w2 * s2
    b2f = b2 * s2 + t2

    mat_dtype = jnp.bfloat16 if use_bf16 else jnp.float32

    # Transposed weights: batch lives on the lane axis inside the kernel.
    w1T = w1f.T.astype(mat_dtype)      # [H1, F]
    w2T = w2f.T.astype(mat_dtype)      # [H2, H1]
    w3T = w3.T.astype(mat_dtype)       # [O, H2]
    wlinT = w_lin.T.astype(mat_dtype)  # [O, F]
    # TODO(synk): if the residual path needs full precision on real data,
    #             stream x in f32 for the wlinT dot (costs an extra x stream).

    # Biases / epilogue stay f32 (accumulation is f32 on the MXU).
    b1c = b1f.T                        # [H1, 1]
    b2c = b2f.T                        # [H2, 1]
    bcat = (b3 + b_lin).T              # [O, 1]
    return w1T, b1c, w2T, b2c, w3T, wlinT, bcat, mat_dtype


def net_forward(x, params, *, block_b=4096, use_bf16=True):
    w1T, b1c, w2T, b2c, w3T, wlinT, bcat, mat_dtype = _fold_params(
        params, use_bf16)

    B, F = x.shape
    H1 = w1T.shape[0]
    H2 = w2T.shape[0]
    O = w3T.shape[0]

    # Lane-dense batch tiling: the batch sits on the lane axis, so tiles must
    # be multiples of 128 lanes and the padded batch a multiple of the tile.
    block_b = max(128, 128 * (block_b // 128))
    Bp = _round_up(B, 128)
    tm = min(block_b, Bp)
    # If everything would fit in one tile but the batch can make two, split so
    # the "parallel" axis produces >= 2 grid steps (v7x megacore gets work).
    if tm == Bp and Bp >= 256:
        tm = _round_up(Bp // 2, 128)
    n_blocks = pl.cdiv(Bp, tm)
    # Rebalance the tile to minimize batch padding at this block count.
    tm = _round_up(pl.cdiv(Bp, n_blocks), 128)
    Bp = n_blocks * tm

    x = x.astype(mat_dtype)
    if Bp != B:
        x = jnp.pad(x, ((0, Bp - B), (0, 0)))
    xT = x.T                                          # [F, Bp]

    # Weights/biases stay resident across the batch grid (index_map -> block 0).
    def resident(shape):
        return pl.BlockSpec(shape, lambda i: (0, 0))

    in_specs = [
        pl.BlockSpec((F, tm), lambda i: (0, i)),      # x^T batch tile (lanes)
        resident(w1T.shape), resident(b1c.shape),
        resident(w2T.shape), resident(b2c.shape),
        resident(w3T.shape), resident(wlinT.shape), resident(bcat.shape),
    ]
    out_specs = pl.BlockSpec((O, tm), lambda i: (0, i))

    itemsize = jnp.dtype(mat_dtype).itemsize
    flops = 2 * Bp * (F * H1 + H1 * H2 + H2 * O + F * O)
    bytes_accessed = (
        Bp * F * itemsize                                   # x stream
        + (F * H1 + H1 * H2 + H2 * O + F * O) * itemsize    # weights
        + (H1 + H2 + O) * 4                                 # biases (f32)
        + Bp * O * 4                                        # output (f32)
    )
    cost = pl.CostEstimate(flops=flops, transcendentals=0,
                           bytes_accessed=bytes_accessed)

    out_t = pl.pallas_call(
        net_kernel,
        out_shape=jax.ShapeDtypeStruct((O, Bp), jnp.float32),
        grid=(n_blocks,),
        in_specs=in_specs,
        out_specs=out_specs,
        compiler_params=pltpu.CompilerParams(
            dimension_semantics=("parallel",)),
        cost_estimate=cost,
    )(xT, w1T, b1c, w2T, b2c, w3T, wlinT, bcat)

    # Back to [B, O] (tiny transpose in XLA; padded rows sliced off).
    return out_t[:, :B].T


# -----------------------------------------------------------------------------
# Deterministic, synthetic parameter construction mirroring Net.__init__.
# -----------------------------------------------------------------------------
def build_params(key, F, hidden_sizes, O, n_fit=64):
    ks = jax.random.split(key, 16)

    # Synthetic (X, Y) used only to fit the least-squares `lin` layer, exactly
    # like the PyTorch __init__: Theta = solve(X_'X_, X_'Y), X_ = [X, 1].
    X = jax.random.normal(ks[0], (n_fit, F), dtype=jnp.float32)
    Y = jax.random.normal(ks[1], (n_fit, O), dtype=jnp.float32)
    X_ = jnp.concatenate([X, jnp.ones((n_fit, 1), jnp.float32)], axis=1)
    Theta = jnp.linalg.solve(X_.T @ X_, X_.T @ Y)        # [(F+1), O]
    w_lin = Theta[:-1, :]                                # [F, O]  (x @ w_lin)
    b_lin = Theta[-1:, :]                                # [1, O]

    H1, H2 = hidden_sizes

    def linear(kw, kb, fan_in, fan_out):
        bound = 1.0 / jnp.sqrt(fan_in)
        w = jax.random.uniform(kw, (fan_in, fan_out), jnp.float32, -bound, bound)
        b = jax.random.uniform(kb, (1, fan_out), jnp.float32, -bound, bound)
        return w, b

    w1, b1 = linear(ks[2], ks[3], F, H1)
    w2, b2 = linear(ks[4], ks[5], H1, H2)
    w3, b3 = linear(ks[6], ks[7], H2, O)

    def bn_fold(kg, kb, km, kv, n, eps=1e-5):
        gamma = 1.0 + 0.1 * jax.random.normal(kg, (1, n), jnp.float32)
        beta = 0.1 * jax.random.normal(kb, (1, n), jnp.float32)
        rmean = 0.1 * jax.random.normal(km, (1, n), jnp.float32)
        rvar = 1.0 + 0.1 * jax.random.uniform(kv, (1, n), jnp.float32)
        scale = gamma / jnp.sqrt(rvar + eps)
        shift = beta - rmean * scale
        return scale, shift

    s1, t1 = bn_fold(ks[8], ks[9], ks[10], ks[11], H1)
    s2, t2 = bn_fold(ks[12], ks[13], ks[14], ks[15], H2)

    return (w_lin, b_lin, w1, b1, s1, t1, w2, b2, s2, t2, w3, b3)


def net_forward_ref(x, params):
    """Pure-JAX reference (unfolded, original module math) for correctness."""
    (w_lin, b_lin, w1, b1, s1, t1, w2, b2, s2, t2, w3, b3) = params
    lin_out = x @ w_lin + b_lin
    h = jnp.maximum((x @ w1 + b1) * s1 + t1, 0.0)
    h = jnp.maximum((h @ w2 + b2) * s2 + t2, 0.0)
    return lin_out + h @ w3 + b3


if __name__ == "__main__":
    key = jax.random.PRNGKey(0)
    k_param, k_x, k_x2 = jax.random.split(key, 3)

    B, F = 8, 16                 # batch, input features
    hidden_sizes = [32, 32]      # hidden_layer_sizes
    O = 4                        # Y.size(1)

    params = build_params(k_param, F, hidden_sizes, O)
    x = jax.random.normal(k_x, (B, F), dtype=jnp.float32)
    ref = net_forward_ref(x, params)

    # f32 matmul operands (tight tolerance).
    out = jax.block_until_ready(net_forward(x, params, use_bf16=False))
    assert out.shape == (B, O)
    assert jnp.allclose(out, ref, rtol=2e-3, atol=2e-3)

    # bf16 matmul operands (default), f32 accumulation/epilogue (loose tol).
    out_bf16 = jax.block_until_ready(net_forward(x, params))
    assert out_bf16.shape == (B, O)
    assert jnp.allclose(out_bf16, ref, rtol=3e-2, atol=3e-2)

    # Larger batch exercising the lane-dense batch grid (padding + 2 tiles,
    # parallel axis for megacore).
    B2 = 1000
    x2 = jax.random.normal(k_x2, (B2, F), dtype=jnp.float32)
    out2 = jax.block_until_ready(net_forward(x2, params, use_bf16=False))
    ref2 = net_forward_ref(x2, params)
    assert out2.shape == (B2, O)
    assert jnp.allclose(out2, ref2, rtol=2e-3, atol=2e-3)

    out2_bf16 = jax.block_until_ready(net_forward(x2, params))
    assert out2_bf16.shape == (B2, O)
    assert jnp.allclose(out2_bf16, ref2, rtol=3e-2, atol=3e-2)

    print("KERNEL_OK")
</pallas_src>

<mosaic_0001>
module attributes {stable_mosaic.version = 11 : i64} {
  func.func @net_kernel(%arg0: i32, %arg1: memref<16x128xf32, #tpu.memory_space<vmem>>, %arg2: memref<32x16xf32, #tpu.memory_space<vmem>>, %arg3: memref<32x1xf32, #tpu.memory_space<vmem>>, %arg4: memref<32x32xf32, #tpu.memory_space<vmem>>, %arg5: memref<32x1xf32, #tpu.memory_space<vmem>>, %arg6: memref<4x32xf32, #tpu.memory_space<vmem>>, %arg7: memref<4x16xf32, #tpu.memory_space<vmem>>, %arg8: memref<4x1xf32, #tpu.memory_space<vmem>>, %arg9: memref<4x128xf32, #tpu.memory_space<vmem>>) attributes {dimension_semantics = [#tpu.dimension_semantics<parallel>], iteration_bounds = array<i64: 1>, scalar_prefetch = 0 : i64, scratch_operands = 0 : i64, tpu.core_type = #tpu.core_type<tc>, window_params = [{transform_indices = @transform_0, window_bounds = array<i64: 16, 128>}, {pipeline_mode = #tpu.pipeline_mode<synchronous>, transform_indices = @transform_1, window_bounds = array<i64: 32, 16>}, {pipeline_mode = #tpu.pipeline_mode<synchronous>, transform_indices = @transform_2, window_bounds = array<i64: 32, 1>}, {pipeline_mode = #tpu.pipeline_mode<synchronous>, transform_indices = @transform_3, window_bounds = array<i64: 32, 32>}, {pipeline_mode = #tpu.pipeline_mode<synchronous>, transform_indices = @transform_4, window_bounds = array<i64: 32, 1>}, {pipeline_mode = #tpu.pipeline_mode<synchronous>, transform_indices = @transform_5, window_bounds = array<i64: 4, 32>}, {pipeline_mode = #tpu.pipeline_mode<synchronous>, transform_indices = @transform_6, window_bounds = array<i64: 4, 16>}, {pipeline_mode = #tpu.pipeline_mode<synchronous>, transform_indices = @transform_7, window_bounds = array<i64: 4, 1>}, {transform_indices = @transform_8, window_bounds = array<i64: 4, 128>}]} {
    %c0 = arith.constant 0 : index
    %c0_0 = arith.constant 0 : index
    %0 = vector.load %arg1[%c0, %c0_0] : memref<16x128xf32, #tpu.memory_space<vmem>>, vector<16x128xf32>
    %c0_1 = arith.constant 0 : index
    %c0_2 = arith.constant 0 : index
    %1 = vector.load %arg2[%c0_1, %c0_2] : memref<32x16xf32, #tpu.memory_space<vmem>>, vector<32x16xf32>
    %cst = arith.constant dense<0.000000e+00> : vector<32x128xf32>
    %2 = tpu.matmul %1, %0, %cst {dimension_numbers = #tpu.dot_dimension_numbers<[1], [0], [0], [1], [0, 0, 1, 1], [], []>} : vector<32x16xf32>, vector<16x128xf32>, vector<32x128xf32> -> vector<32x128xf32>
    %c0_3 = arith.constant 0 : index
    %c0_4 = arith.constant 0 : index
    %3 = vector.load %arg3[%c0_3, %c0_4] : memref<32x1xf32, #tpu.memory_space<vmem>>, vector<32x1xf32>
    %4 = vector.broadcast %3 : vector<32x1xf32> to vector<32x128xf32>
    %5 = arith.addf %2, %4 : vector<32x128xf32>
    %cst_5 = arith.constant 0.000000e+00 : f32
    %6 = vector.broadcast %cst_5 : f32 to vector<32x128xf32>
    %7 = arith.maximumf %5, %6 : vector<32x128xf32>
    %c0_6 = arith.constant 0 : index
    %c0_7 = arith.constant 0 : index
    %8 = vector.load %arg4[%c0_6, %c0_7] : memref<32x32xf32, #tpu.memory_space<vmem>>, vector<32x32xf32>
    %cst_8 = arith.constant dense<0.000000e+00> : vector<32x128xf32>
    %9 = tpu.matmul %8, %7, %cst_8 {dimension_numbers = #tpu.dot_dimension_numbers<[1], [0], [0], [1], [0, 0, 1, 1], [], []>} : vector<32x32xf32>, vector<32x128xf32>, vector<32x128xf32> -> vector<32x128xf32>
    %c0_9 = arith.constant 0 : index
    %c0_10 = arith.constant 0 : index
    %10 = vector.load %arg5[%c0_9, %c0_10] : memref<32x1xf32, #tpu.memory_space<vmem>>, vector<32x1xf32>
    %11 = vector.broadcast %10 : vector<32x1xf32> to vector<32x128xf32>
    %12 = arith.addf %9, %11 : vector<32x128xf32>
    %cst_11 = arith.constant 0.000000e+00 : f32
    %13 = vector.broadcast %cst_11 : f32 to vector<32x128xf32>
    %14 = arith.maximumf %12, %13 : vector<32x128xf32>
    %c0_12 = arith.constant 0 : index
    %c0_13 = arith.constant 0 : index
    %15 = vector.load %arg6[%c0_12, %c0_13] : memref<4x32xf32, #tpu.memory_space<vmem>>, vector<4x32xf32>
    %cst_14 = arith.constant dense<0.000000e+00> : vector<4x128xf32>
    %16 = tpu.matmul %15, %14, %cst_14 {dimension_numbers = #tpu.dot_dimension_numbers<[1], [0], [0], [1], [0, 0, 1, 1], [], []>} : vector<4x32xf32>, vector<32x128xf32>, vector<4x128xf32> -> vector<4x128xf32>
    %c0_15 = arith.constant 0 : index
    %c0_16 = arith.constant 0 : index
    %17 = vector.load %arg7[%c0_15, %c0_16] : memref<4x16xf32, #tpu.memory_space<vmem>>, vector<4x16xf32>
    %cst_17 = arith.constant dense<0.000000e+00> : vector<4x128xf32>
    %18 = tpu.matmul %17, %0, %cst_17 {dimension_numbers = #tpu.dot_dimension_numbers<[1], [0], [0], [1], [0, 0, 1, 1], [], []>} : vector<4x16xf32>, vector<16x128xf32>, vector<4x128xf32> -> vector<4x128xf32>
    %19 = arith.addf %16, %18 : vector<4x128xf32>
    %c0_18 = arith.constant 0 : index
    %c0_19 = arith.constant 0 : index
    %20 = vector.load %arg8[%c0_18, %c0_19] : memref<4x1xf32, #tpu.memory_space<vmem>>, vector<4x1xf32>
    %21 = vector.broadcast %20 : vector<4x1xf32> to vector<4x128xf32>
    %22 = arith.addf %19, %21 : vector<4x128xf32>
    %c0_20 = arith.constant 0 : index
    %c0_21 = arith.constant 0 : index
    %23 = vector.load %arg9[%c0_20, %c0_21] : memref<4x128xf32, #tpu.memory_space<vmem>>, vector<4x128xf32>
    tpu.vector_store %arg9[%c0_20, %c0_21], %22 {strides = array<i32>} : memref<4x128xf32, #tpu.memory_space<vmem>>, vector<4x128xf32>,
    return
  }
  func.func @transform_0(%arg0: i32) -> (i32, i32) {
    %c0_i32 = arith.constant 0 : i32
    %c0_i32_0 = arith.constant 0 : i32
    return %c0_i32, %arg0 : i32, i32
  }
  func.func @transform_1(%arg0: i32) -> (i32, i32) {
    %c0_i32 = arith.constant 0 : i32
    %c0_i32_0 = arith.constant 0 : i32
    %c0_i32_1 = arith.constant 0 : i32
    return %c0_i32, %c0_i32_0 : i32, i32
  }
  func.func @transform_2(%arg0: i32) -> (i32, i32) {
    %c0_i32 = arith.constant 0 : i32
    %c0_i32_0 = arith.constant 0 : i32
    %c0_i32_1 = arith.constant 0 : i32
    return %c0_i32, %c0_i32_0 : i32, i32
  }
  func.func @transform_3(%arg0: i32) -> (i32, i32) {
    %c0_i32 = arith.constant 0 : i32
    %c0_i32_0 = arith.constant 0 : i32
    %c0_i32_1 = arith.constant 0 : i32
    return %c0_i32, %c0_i32_0 : i32, i32
  }
  func.func @transform_4(%arg0: i32) -> (i32, i32) {
    %c0_i32 = arith.constant 0 : i32
    %c0_i32_0 = arith.constant 0 : i32
    %c0_i32_1 = arith.constant 0 : i32
    return %c0_i32, %c0_i32_0 : i32, i32
  }
  func.func @transform_5(%arg0: i32) -> (i32, i32) {
    %c0_i32 = arith.constant 0 : i32
    %c0_i32_0 = arith.constant 0 : i32
    %c0_i32_1 = arith.constant 0 : i32
    return %c0_i32, %c0_i32_0 : i32, i32
  }
  func.func @transform_6(%arg0: i32) -> (i32, i32) {
    %c0_i32 = arith.constant 0 : i32
    %c0_i32_0 = arith.constant 0 : i32
    %c0_i32_1 = arith.constant 0 : i32
    return %c0_i32, %c0_i32_0 : i32, i32
  }
  func.func @transform_7(%arg0: i32) -> (i32, i32) {
    %c0_i32 = arith.constant 0 : i32
    %c0_i32_0 = arith.constant 0 : i32
    %c0_i32_1 = arith.constant 0 : i32
    return %c0_i32, %c0_i32_0 : i32, i32
  }
  func.func @transform_8(%arg0: i32) -> (i32, i32) {
    %c0_i32 = arith.constant 0 : i32
    %c0_i32_0 = arith.constant 0 : i32
    return %c0_i32, %arg0 : i32, i32
  }
}

</mosaic_0001>

<bundles_post_ra>
// kernel: tpu_custom_call.1
= control target key start
LH: loop header
LB: loop body
LE: loop exit
PB: predicated region body
PF: predicated region fallthrough
CT: control target
= control target key end

     0   :  { %vm60_vm0 = vcmask 130048   ;;  %v588_v4 = vmov 0   ;;  %s728_s0 = inlined_call_operand.vmem [shape: f32[16,128], index: 0, kind: input, shape index: {}]   ;;  %s729_s1 = inlined_call_operand.vmem [shape: f32[32,16], index: 1, kind: input, shape index: {}]   ;;  %s730_s2 = inlined_call_operand.vmem [shape: f32[32,1], index: 2, kind: input, shape index: {}]   ;;  %s731_s3 = inlined_call_operand.vmem [shape: f32[32,32], index: 3, kind: input, shape index: {}]   ;;  %s732_s4 = inlined_call_operand.vmem [shape: f32[32,1], index: 4, kind: input, shape index: {}]   ;;  %s733_s5 = inlined_call_operand.vmem [shape: f32[4,32], index: 5, kind: input, shape index: {}]   ;;  %s734_s6 = inlined_call_operand.vmem [shape: f32[4,16], index: 6, kind: input, shape index: {}]   ;;  %s735_s7 = inlined_call_operand.vmem [shape: f32[4,1], index: 7, kind: input, shape index: {}]   ;;  %s736_s8 = inlined_call_operand.hbm [shape: f32[4,128], index: 8, kind: output, shape index: {}]  }
   0x1   :  { %v30_v0 = vld [vmem:[%s728_s0] sm:$0xff]  ;;  %v31_v1 = vld [vmem:[%s728_s0 + $0x8] sm:$0xff]  ;;  %562 = vset.pattern.permute.xlu0 %v588_v4  ;;  %563 = vset.pattern.permute.xlu1 %v588_v4  ;;  %v38_v6 = vld [vmem:[%s730_s2 + $0x10] sm:$0xff] }
   0x2   :  { %v32_v2 = vld [vmem:[%s729_s1] sm:$0xff]  ;;  %v647_v3 = vpack.c.bf16 %v31_v1, %v30_v0  ;;  %v33_v7 = vld [vmem:[%s729_s1 + $0x8] sm:$0xff]  ;;  %52 = vperm.xlu1 %563, %v38_v6   ;;  %v34_v9 = vld [vmem:[%s729_s1 + $0x10] sm:$0xff] }
   0x3   :  { %498 = vmatprep.mubr.msk.f32.mxu0 %vm60_vm0, %v32_v2  ;;  %v36_v5 = vld [vmem:[%s730_s2] sm:$0xff]  ;;  %v37_v8 = vld [vmem:[%s730_s2 + $0x8] sm:$0xff]  ;;  %v39_v10 = vld [vmem:[%s730_s2 + $0x18] sm:$0xff] }
   0x4   :  { %537 = vmatprep.subr.bf16.mxu0 %v647_v3  ;;  %42 = vperm.xlu0 %562, %v36_v5  }
   0x5   :  { %539 = vmatpush3.bf16.msra.mxu0 %v647_v3 }
   0x6   :  { %13 = vsyncpa [#allocation3], 0  ;;  %v35_v11 = vld [vmem:[%s729_s1 + $0x18] sm:$0xff]  ;;  %v166_v12 = vld [vmem:[%s732_s4] sm:$0xff]  ;;  %57 = vperm.xlu1 %563, %v39_v10   ;;  %vm190_vm1 = vcmask 261120   ;;  %v589_v39 = vmov 0.0|0.0  }
   0x7   :  { %v167_v13 = vld [vmem:[%s732_s4 + $0x8] sm:$0xff]  ;;  %v168_v14 = vld [vmem:[%s732_s4 + $0x10] sm:$0xff]  ;;  %v169_v15 = vld [vmem:[%s732_s4 + $0x18] sm:$0xff]  ;;  %548 = vmatprep.subr.bf16.mxu0 %v589_v39  ;;  %vm590_vm2 = vmmov 0   ;;  %v591_v41 = vmov 0.0   ;;  %s592_s17 = smov [#allocation2]  }
   0x8   :  { %499 = vmatmul.mubr.msk.f32.vlgmr.msra.gmra.mrb[0].mxu0 %vm60_vm0, %v33_v7  ;;  %47 = vperm.xlu0 %562, %v37_v8   ;;  %v440_v16 = vld [vmem:[%s735_s7] sm:$0xf]  ;;  %v163_v36 = vld [vmem:[%s731_s3 + $0x8] sm:$0xff]  ;;  %v164_v37 = vld [vmem:[%s731_s3 + $0x10] sm:$0xff]  ;;  %s454_s18 = sshll.u32 %s592_s17, 4  ;;  %s455_s18 = int_to_ptr.vmem [resolvable:$true] %s454_s18 }
   0x9   :  { %501 = vmatprep.mubr.msk.f32.mxu0 %vm60_vm0, %v34_v9  ;;  %v162_v17 = vld [vmem:[%s731_s3] sm:$0xff]  ;;  %v165_v38 = vld [vmem:[%s731_s3 + $0x18] sm:$0xff]  ;;  %550 = vmatpush3.bf16.msra.mxu0 %v647_v3  ;;  %s564_s19 = scalar_lea.vmem %s455_s18, 64  ;;  %p569_p1 = scmp.lt.s32.totalorder %s455_s18, %s455_s18 }
   0xa   :  { %177 = vperm.xlu1 %563, %v167_v13   ;;  %512 = vmatprep.mubr.msk.f32.mxu1 %vm190_vm1, %v162_v17  ;;  %v293_v40 = vld [vmem:[%s734_s6] sm:$0xf]  ;;  %p565_p0 = scmp.ne.s32.totalorder %s455_s18, %s564_s19  ;;  %p570_p2 = scmp.lt.s32.totalorder %s564_s19, %s564_s19 }
   0xb   :  { %v292_v60 = vld [vmem:[%s733_s5] sm:$0xf] }
   0xc   :  { %502 = vmatmul.mubr.msk.f32.gmra.mrb[2].mxu0 %vm60_vm0, %v35_v11  ;;  %172 = vperm.xlu0 %562, %v166_v12   ;;  %p571_p3 = por %p570_p2, %p569_p1 }
   0xd   :  { %522 = vmatprep.mubr.msk.f32.mxu0 %vm590_vm2, %v591_v41 }
   0xe   :  { %187 = vperm.xlu1 %563, %v169_v15   ;;  %p572_p4 = pnand %p571_p3, %p565_p0 }
  0x10   :  { %182 = vperm.xlu0 %562, %v168_v14   ;;  %523 = vmatmul.mubr.msk.f32.vlgmr.msra.gmra.mrb[4].mxu0 %vm60_vm0, %v293_v40 }
  0x14   :  { %443 = vperm.xlu0 %562, %v440_v16  }
  0x81   :  { %v53_v19 = vpop.permute.xlu1 %52 }
  0x83   :  { %v43_v18 = vpop.permute.xlu0 %42 }
  0x85   :  { %v58_v26 = vpop.permute.xlu1 %57 }
  0x87   :  { %v48_v20 = vpop.permute.xlu0 %47 }
  0x89   :  { %v178_v42 = vpop.permute.xlu1 %177 }
  0x8b   :  { %v173_v43 = vpop.permute.xlu0 %172 }
  0x8d   :  { %v188_v49 = vpop.permute.xlu1 %187 }
  0x8f   :  { %v183_v52 = vpop.permute.xlu0 %182 }
  0x93   :  { %v444_v2 = vpop.permute.xlu0 %443 }
  0xdb   :  { %v500_v21 = vpop.f32.mrb[0].mxu0 }
  0xdc   :  { %v145_v22 = vadd.f32 %v500_v21, %v48_v20  ;;  %v139_v23 = vpop.f32.mrb[1].mxu0 }
  0xdd   :  { %v140_v24 = vadd.f32 %v139_v23, %v43_v18 }
  0xde   :  { %v159_v25 = vmax.f32 %v145_v22, 0.0 }
  0xdf   :  { %v158_v27 = vmax.f32 %v140_v24, 0.0  ;;  %v503_v28 = vpop.f32.mrb[2].mxu0 }
  0xe0   :  { %v155_v29 = vadd.f32 %v503_v28, %v58_v26  ;;  %v149_v30 = vpop.f32.mrb[3].mxu0 }
  0xe1   :  { %v150_v31 = vadd.f32 %v149_v30, %v53_v19  ;;  %v540_v32 = vpack.c.bf16 %v159_v25, %v158_v27 }
  0xe2   :  { %v161_v33 = vmax.f32 %v155_v29, 0.0 }
  0xe3   :  { %v160_v34 = vmax.f32 %v150_v31, 0.0  ;;  %541 = vmatprep.subr.bf16.mxu1 %v540_v32  ;;  %v363_v61 = vpop.f32.mrb[4].mxu0 }
  0xe4   :  { %543 = vmatpush3.bf16.msra.mxu1 %v540_v32  ;;  %v524_v62 = vpop.f32.mrb[5].mxu0 }
  0xe5   :  { %v544_v35 = vpack.c.bf16 %v161_v33, %v160_v34 }
  0xe7   :  { %545 = vmatprep.subr.bf16.mxu1 %v544_v35 }
  0xe8   :  { %547 = vmatpush3.bf16.msra.mxu1 %v544_v35 }
  0xe9   :  { %551 = vmatprep.subr.bf16.mxu1 %v589_v39 }
  0xeb   :  { %513 = vmatmul.mubr.msk.f32.vlgmr.msra.gmra.mrb[0].mxu1 %vm190_vm1, %v163_v36 }
  0xec   :  { %515 = vmatprep.mubr.msk.f32.mxu1 %vm190_vm1, %v164_v37 }
  0xef   :  { %516 = vmatmul.mubr.msk.f32.gmra.mrb[2].mxu1 %vm190_vm1, %v165_v38 }
  0xf0   :  { %533 = vmatprep.mubr.msk.f32.mxu1 %vm590_vm2, %v591_v41 }
 0x1be   :  { %v514_v44 = vpop.f32.mrb[0].mxu1 }
 0x1bf   :  { %v275_v45 = vadd.f32 %v514_v44, %v178_v42  ;;  %v269_v46 = vpop.f32.mrb[1].mxu1 }
 0x1c0   :  { %v270_v47 = vadd.f32 %v269_v46, %v173_v43 }
 0x1c1   :  { %v289_v48 = vmax.f32 %v275_v45, 0.0 }
 0x1c2   :  { %v288_v50 = vmax.f32 %v270_v47, 0.0  ;;  %v517_v51 = vpop.f32.mrb[2].mxu1 }
 0x1c3   :  { %v285_v53 = vadd.f32 %v517_v51, %v188_v49  ;;  %v279_v54 = vpop.f32.mrb[3].mxu1 }
 0x1c4   :  { %v552_v55 = vpack.c.bf16 %v289_v48, %v288_v50  ;;  %v280_v56 = vadd.f32 %v279_v54, %v183_v52 }
 0x1c5   :  { %v291_v57 = vmax.f32 %v285_v53, 0.0 }
 0x1c6   :  { %v290_v58 = vmax.f32 %v280_v56, 0.0  ;;  %553 = vmatpush3.bf16.msra.mxu1 %v552_v55 }
 0x1c7   :  { %554 = vmatprep.subr.bf16.mxu1 %v589_v39 }
 0x1c8   :  { %v555_v59 = vpack.c.bf16 %v291_v57, %v290_v58 }
 0x1ca   :  { %556 = vmatpush3.bf16.msra.mxu1 %v555_v59 }
 0x1cd   :  { %534 = vmatmul.mubr.msk.f32.vlgmr.msra.gmra.mrb[4].mxu1 %vm190_vm1, %v292_v60 }
 0x2a0   :  { %v436_v63 = vpop.f32.mrb[4].mxu1 }
 0x2a1   :  { %v437_v0 = vadd.f32 %v436_v63, %v363_v61  ;;  %v535_v1 = vpop.f32.mrb[5].mxu1 }
 0x2a3   :  { %v446_v3 = vadd.f32 %v444_v2, %v437_v0 }
 0x2a5   :  { %447 = vst [vmem:[#allocation2] sm:$0xf] %v446_v3 }
 0x2a6   :  { %575 = shalt.err (!%p572_p4)
}
 0x2a7   :  { %s576_s21 = scalar_lea.hbm %s736_s8, 64 }
 0x2a8   :  { %p577_p5 = scmp.ne.s32.totalorder %s736_s8, %s576_s21  ;;  %p580_p6 = scmp.lt.u32.totalorder %s576_s21, %s736_s8 }
 0x2aa   :  { %p582_p7 = pnand %p580_p6, %p577_p5 }
 0x2ac   :  { %585 = shalt.err (!%p582_p7)
}
 0x2ad   :  { %457 = dma.vmem_to_hbm [thread:$0]  %s455_s18, 64, %s736_s8, [#allocation3]  }
 0x2ae   :  { %586 = dma.done.wait [#allocation3], 64  }
 0x2af   :  { %587 = vsyncadd [#allocation3], 4294967232 }
 0x2b0   :  { %461 = vsyncpa [#allocation3], 1 }

</bundles_post_ra>
